<compile_context>
chip_gen: v7x
topology: tpu7x:2x2x1
jax: 0.10.0
libtpu: 0.0.40
codegen_flags: <defaults>
</compile_context>

<pallas_src>
import functools
import math

import jax
import jax.numpy as jnp
from jax.experimental import pallas as pl
from jax.experimental.pallas import tpu as pltpu


def _round_up(n, m):
    return (n + m - 1) // m * m


def _m2lstm_fused_kernel(*refs, num_layers, hs_pad, activate):
    # refs = (x_ref, h0_ref, c0_ref, W0, U0, B0, W1, U1, B1, ..., out_ref)
    # x_ref:  (tm, F)      h0_ref: (tm, HS)      c0_ref: (tm, HSP)
    # W_i:    (in_dim, 4*HSP)   U_i: (HS, 4*HSP)   B_i: (1, 4*HSP)
    # out_ref: (tm, HSP)
    x_ref, h0_ref, c0_ref = refs[0], refs[1], refs[2]
    out_ref = refs[-1]
    HSP = hs_pad

    h0 = h0_ref[...]
    c0 = c0_ref[...]
    cur = x_ref[...]

    for i in range(num_layers):
        w_ref = refs[3 + 3 * i]
        u_ref = refs[3 + 3 * i + 1]
        b_ref = refs[3 + 3 * i + 2]
        cd = w_ref.dtype  # optional bf16 matmul path; f32 accumulation either way
        gates = (jnp.dot(cur.astype(cd), w_ref[...],
                         preferred_element_type=jnp.float32)
                 + jnp.dot(h0.astype(cd), u_ref[...],
                           preferred_element_type=jnp.float32)
                 + b_ref[...])

        # 4*HSP gate lanes; each HSP-wide slice is lane-group aligned.
        i_t = jax.nn.sigmoid(gates[:, 0 * HSP:1 * HSP])
        f_t = jax.nn.sigmoid(gates[:, 1 * HSP:2 * HSP])
        g_t = jnp.tanh(gates[:, 2 * HSP:3 * HSP])
        o_t = jax.nn.sigmoid(gates[:, 3 * HSP:4 * HSP])

        c_new = f_t * c0 + i_t * g_t
        if activate == 'relu':
            act = jnp.maximum(c_new, 0.0)
        elif activate == 'Leaky_relu':
            act = jnp.where(c_new >= 0, c_new, 0.8 * c_new)
        elif activate == 'tanh':
            act = jnp.tanh(c_new)
        else:
            raise Exception('Unsupported activate function')
        cur = o_t * act  # next layer's input (stays in VMEM/vregs)

    out_ref[...] = cur.astype(out_ref.dtype)


def m2lstm_forward(x, init_states, Ws, Us, Bs, *, hidden_sz, activate='tanh',
                   tile_m=512, compute_dtype=jnp.float32):
    """x: (seq_sz, bs, feat).  init_states = (h0, c0), each (seq_sz, bs, HS).
    Returns (hidden_seq (seq_sz, bs, HS), (h0, c0))."""
    if activate not in ('relu', 'Leaky_relu', 'tanh'):
        raise Exception('Unsupported activate function')
    h0, c0 = init_states
    S, T, F = x.shape
    HS = hidden_sz
    HSP = _round_up(HS, 128)          # lane-aligned hidden width
    G4 = 4 * HSP
    L = len(Ws)
    M = S * T

    # ---- flatten (S, T) -> M rows: contiguous reshape, no transpose ----
    x_flat = x.reshape(M, F).astype(jnp.float32)
    h0_flat = h0.reshape(M, HS).astype(jnp.float32)
    c0_flat = c0.reshape(M, HS).astype(jnp.float32)
    if HSP != HS:
        c0_flat = jnp.pad(c0_flat, ((0, 0), (0, HSP - HS)))

    # ---- row tiling ----
    tm = min(tile_m, _round_up(M, 8))
    M_pad = _round_up(M, tm)
    if M_pad != M:
        rpad = ((0, M_pad - M), (0, 0))
        x_flat = jnp.pad(x_flat, rpad)
        h0_flat = jnp.pad(h0_flat, rpad)
        c0_flat = jnp.pad(c0_flat, rpad)

    def _pad_gate_cols(a):            # (rows, 4*HS) -> (rows, 4*HSP), zeros
        if HSP == HS:
            return a
        r = a.shape[0]
        return jnp.pad(a.reshape(r, 4, HS),
                       ((0, 0), (0, 0), (0, HSP - HS))).reshape(r, G4)

    params = []
    in_specs = [
        pl.BlockSpec((tm, F), lambda m: (m, 0)),      # x rows
        pl.BlockSpec((tm, HS), lambda m: (m, 0)),     # h0 rows
        pl.BlockSpec((tm, HSP), lambda m: (m, 0)),    # c0 rows (lane padded)
    ]
    for i in range(L):
        W = jnp.asarray(Ws[i], jnp.float32)
        U = jnp.asarray(Us[i], jnp.float32)
        B = jnp.asarray(Bs[i], jnp.float32).reshape(1, 4 * HS)
        Wp = _pad_gate_cols(W)
        if i > 0 and HSP != HS:
            # layers >= 1 consume the HSP-wide in-VMEM intermediate
            Wp = jnp.pad(Wp, ((0, HSP - HS), (0, 0)))
        Up = _pad_gate_cols(U)
        Bp = _pad_gate_cols(B)
        in_dim = Wp.shape[0]
        params += [Wp.astype(compute_dtype), Up.astype(compute_dtype), Bp]
        in_specs += [
            pl.BlockSpec((in_dim, G4), lambda m: (0, 0)),
            pl.BlockSpec((HS, G4), lambda m: (0, 0)),
            pl.BlockSpec((1, G4), lambda m: (0, 0)),
        ]

    kernel = functools.partial(_m2lstm_fused_kernel,
                               num_layers=L, hs_pad=HSP, activate=activate)

    out_flat = pl.pallas_call(
        kernel,
        out_shape=jax.ShapeDtypeStruct((M_pad, HSP), jnp.float32),
        grid=(M_pad // tm,),
        in_specs=in_specs,
        out_specs=pl.BlockSpec((tm, HSP), lambda m: (m, 0)),
        compiler_params=pltpu.CompilerParams(
            dimension_semantics=("parallel",),
            vmem_limit_bytes=32 * 1024 * 1024),   # fits v7x (64 MiB) and v5e/v6e
    )(x_flat, h0_flat, c0_flat, *params)

    hidden_seq = out_flat[:M, :HS].reshape(S, T, HS)
    return hidden_seq, (h0, c0)


def m2lstm_reference(x, init_states, Ws, Us, Bs, *, hidden_sz, activate='tanh'):
    """Pure-JAX port of the PyTorch forward, for verification."""
    h0, c0 = init_states
    S, T, F = x.shape
    HS = hidden_sz
    cur = x
    for i in range(len(Ws)):
        outs = []
        for t in range(T):
            x_t = cur[:, t, :]
            ht = h0[:, t, :]
            ct = c0[:, t, :]
            gates = x_t @ Ws[i] + ht @ Us[i] + Bs[i].reshape(1, 4 * HS)
            i_t = jax.nn.sigmoid(gates[:, :HS])
            f_t = jax.nn.sigmoid(gates[:, HS:2 * HS])
            g_t = jnp.tanh(gates[:, 2 * HS:3 * HS])
            o_t = jax.nn.sigmoid(gates[:, 3 * HS:])
            c_new = f_t * ct + i_t * g_t
            if activate == 'relu':
                h_new = o_t * jnp.maximum(c_new, 0.0)
            elif activate == 'Leaky_relu':
                h_new = o_t * jnp.where(c_new >= 0, c_new, 0.8 * c_new)
            else:
                h_new = o_t * jnp.tanh(c_new)
            outs.append(h_new)
        cur = jnp.stack(outs, axis=1)
    return cur, (h0, c0)


if __name__ == "__main__":
    # Small shapes consistent with the module's forward.
    seq_sz, bs, feat = 8, 4, 32      # x: (seq_sz, bs, feat); "bs" is the time axis
    input_sz = feat
    hidden_sz = 32
    num_layers = 2
    activate = 'tanh'

    key = jax.random.PRNGKey(0)
    k_x, k_h, k_c, k_p = jax.random.split(key, 4)

    x = jax.random.normal(k_x, (seq_sz, bs, feat), dtype=jnp.float32)
    h0 = jax.random.normal(k_h, (seq_sz, bs, hidden_sz), dtype=jnp.float32)
    c0 = jax.random.normal(k_c, (seq_sz, bs, hidden_sz), dtype=jnp.float32)

    # Deterministic parameter init: uniform(-stdv, stdv), stdv = 1/sqrt(HS)
    stdv = 1.0 / math.sqrt(hidden_sz)
    Ws, Us, Bs = [], [], []
    pkeys = jax.random.split(k_p, num_layers * 3)
    for i in range(num_layers):
        in_dim = input_sz if i == 0 else hidden_sz
        kw, ku, kb = pkeys[3 * i], pkeys[3 * i + 1], pkeys[3 * i + 2]
        Ws.append(jax.random.uniform(kw, (in_dim, hidden_sz * 4),
                                     minval=-stdv, maxval=stdv,
                                     dtype=jnp.float32))
        Us.append(jax.random.uniform(ku, (hidden_sz, hidden_sz * 4),
                                     minval=-stdv, maxval=stdv,
                                     dtype=jnp.float32))
        Bs.append(jax.random.uniform(kb, (hidden_sz * 4,),
                                     minval=-stdv, maxval=stdv,
                                     dtype=jnp.float32))

    out, (h_ret, c_ret) = m2lstm_forward(
        x, (h0, c0), Ws, Us, Bs, hidden_sz=hidden_sz, activate=activate)
    out = jax.block_until_ready(out)

    ref_out, _ = m2lstm_reference(
        x, (h0, c0), Ws, Us, Bs, hidden_sz=hidden_sz, activate=activate)
    ref_out = jax.block_until_ready(ref_out)

    assert out.shape == (seq_sz, bs, hidden_sz)
    assert jnp.max(jnp.abs(out - ref_out)) < 1e-4, "mismatch vs. reference"
    print("KERNEL_OK")
</pallas_src>

<mosaic_0001>
module attributes {stable_mosaic.version = 11 : i64} {
  func.func @_m2lstm_fused_kernel(%arg0: i32, %arg1: memref<32x32xf32, #tpu.memory_space<vmem>>, %arg2: memref<32x32xf32, #tpu.memory_space<vmem>>, %arg3: memref<32x128xf32, #tpu.memory_space<vmem>>, %arg4: memref<32x512xf32, #tpu.memory_space<vmem>>, %arg5: memref<32x512xf32, #tpu.memory_space<vmem>>, %arg6: memref<1x512xf32, #tpu.memory_space<vmem>>, %arg7: memref<128x512xf32, #tpu.memory_space<vmem>>, %arg8: memref<32x512xf32, #tpu.memory_space<vmem>>, %arg9: memref<1x512xf32, #tpu.memory_space<vmem>>, %arg10: memref<32x128xf32, #tpu.memory_space<vmem>>) attributes {dimension_semantics = [#tpu.dimension_semantics<parallel>], iteration_bounds = array<i64: 1>, scalar_prefetch = 0 : i64, scratch_operands = 0 : i64, tpu.core_type = #tpu.core_type<tc>, window_params = [{transform_indices = @transform_0, window_bounds = array<i64: 32, 32>}, {transform_indices = @transform_1, window_bounds = array<i64: 32, 32>}, {transform_indices = @transform_2, window_bounds = array<i64: 32, 128>}, {pipeline_mode = #tpu.pipeline_mode<synchronous>, transform_indices = @transform_3, window_bounds = array<i64: 32, 512>}, {pipeline_mode = #tpu.pipeline_mode<synchronous>, transform_indices = @transform_4, window_bounds = array<i64: 32, 512>}, {pipeline_mode = #tpu.pipeline_mode<synchronous>, transform_indices = @transform_5, window_bounds = array<i64: 1, 512>}, {pipeline_mode = #tpu.pipeline_mode<synchronous>, transform_indices = @transform_6, window_bounds = array<i64: 128, 512>}, {pipeline_mode = #tpu.pipeline_mode<synchronous>, transform_indices = @transform_7, window_bounds = array<i64: 32, 512>}, {pipeline_mode = #tpu.pipeline_mode<synchronous>, transform_indices = @transform_8, window_bounds = array<i64: 1, 512>}, {transform_indices = @transform_9, window_bounds = array<i64: 32, 128>}]} {
    %c0 = arith.constant 0 : index
    %c0_0 = arith.constant 0 : index
    %0 = vector.load %arg2[%c0, %c0_0] : memref<32x32xf32, #tpu.memory_space<vmem>>, vector<32x32xf32>
    %c0_1 = arith.constant 0 : index
    %c0_2 = arith.constant 0 : index
    %1 = vector.load %arg3[%c0_1, %c0_2] : memref<32x128xf32, #tpu.memory_space<vmem>>, vector<32x128xf32>
    %c0_3 = arith.constant 0 : index
    %c0_4 = arith.constant 0 : index
    %2 = vector.load %arg1[%c0_3, %c0_4] : memref<32x32xf32, #tpu.memory_space<vmem>>, vector<32x32xf32>
    %c0_5 = arith.constant 0 : index
    %c0_6 = arith.constant 0 : index
    %3 = vector.load %arg4[%c0_5, %c0_6] : memref<32x512xf32, #tpu.memory_space<vmem>>, vector<32x512xf32>
    %cst = arith.constant dense<0.000000e+00> : vector<32x512xf32>
    %4 = tpu.matmul %2, %3, %cst {dimension_numbers = #tpu.dot_dimension_numbers<[1], [0], [0], [1], [0, 0, 1, 1], [], []>} : vector<32x32xf32>, vector<32x512xf32>, vector<32x512xf32> -> vector<32x512xf32>
    %c0_7 = arith.constant 0 : index
    %c0_8 = arith.constant 0 : index
    %5 = vector.load %arg5[%c0_7, %c0_8] : memref<32x512xf32, #tpu.memory_space<vmem>>, vector<32x512xf32>
    %cst_9 = arith.constant dense<0.000000e+00> : vector<32x512xf32>
    %6 = tpu.matmul %0, %5, %cst_9 {dimension_numbers = #tpu.dot_dimension_numbers<[1], [0], [0], [1], [0, 0, 1, 1], [], []>} : vector<32x32xf32>, vector<32x512xf32>, vector<32x512xf32> -> vector<32x512xf32>
    %7 = arith.addf %4, %6 : vector<32x512xf32>
    %c0_10 = arith.constant 0 : index
    %c0_11 = arith.constant 0 : index
    %8 = vector.load %arg6[%c0_10, %c0_11] : memref<1x512xf32, #tpu.memory_space<vmem>>, vector<1x512xf32>
    %9 = vector.broadcast %8 : vector<1x512xf32> to vector<32x512xf32>
    %10 = arith.addf %7, %9 : vector<32x512xf32>
    %11 = vector.extract_strided_slice %10 {offsets = [0, 0], sizes = [32, 128], strides = [1, 1]} : vector<32x512xf32> to vector<32x128xf32>
    %12 = arith.negf %11 : vector<32x128xf32>
    %13 = math.exp %12 : vector<32x128xf32>
    %cst_12 = arith.constant 1.000000e+00 : f32
    %14 = vector.broadcast %cst_12 : f32 to vector<32x128xf32>
    %15 = arith.addf %14, %13 : vector<32x128xf32>
    %16 = arith.divf %14, %15 : vector<32x128xf32>
    %17 = vector.extract_strided_slice %10 {offsets = [0, 128], sizes = [32, 128], strides = [1, 1]} : vector<32x512xf32> to vector<32x128xf32>
    %18 = arith.negf %17 : vector<32x128xf32>
    %19 = math.exp %18 : vector<32x128xf32>
    %cst_13 = arith.constant 1.000000e+00 : f32
    %20 = vector.broadcast %cst_13 : f32 to vector<32x128xf32>
    %21 = arith.addf %20, %19 : vector<32x128xf32>
    %22 = arith.divf %20, %21 : vector<32x128xf32>
    %23 = vector.extract_strided_slice %10 {offsets = [0, 256], sizes = [32, 128], strides = [1, 1]} : vector<32x512xf32> to vector<32x128xf32>
    %24 = math.tanh %23 : vector<32x128xf32>
    %25 = vector.extract_strided_slice %10 {offsets = [0, 384], sizes = [32, 128], strides = [1, 1]} : vector<32x512xf32> to vector<32x128xf32>
    %26 = arith.negf %25 : vector<32x128xf32>
    %27 = math.exp %26 : vector<32x128xf32>
    %cst_14 = arith.constant 1.000000e+00 : f32
    %28 = vector.broadcast %cst_14 : f32 to vector<32x128xf32>
    %29 = arith.addf %28, %27 : vector<32x128xf32>
    %30 = arith.divf %28, %29 : vector<32x128xf32>
    %31 = arith.mulf %22, %1 : vector<32x128xf32>
    %32 = arith.mulf %16, %24 : vector<32x128xf32>
    %33 = arith.addf %31, %32 : vector<32x128xf32>
    %34 = math.tanh %33 : vector<32x128xf32>
    %35 = arith.mulf %30, %34 : vector<32x128xf32>
    %c0_15 = arith.constant 0 : index
    %c0_16 = arith.constant 0 : index
    %36 = vector.load %arg7[%c0_15, %c0_16] : memref<128x512xf32, #tpu.memory_space<vmem>>, vector<128x512xf32>
    %cst_17 = arith.constant dense<0.000000e+00> : vector<32x512xf32>
    %37 = tpu.matmul %35, %36, %cst_17 {dimension_numbers = #tpu.dot_dimension_numbers<[1], [0], [0], [1], [0, 0, 1, 1], [], []>} : vector<32x128xf32>, vector<128x512xf32>, vector<32x512xf32> -> vector<32x512xf32>
    %c0_18 = arith.constant 0 : index
    %c0_19 = arith.constant 0 : index
    %38 = vector.load %arg8[%c0_18, %c0_19] : memref<32x512xf32, #tpu.memory_space<vmem>>, vector<32x512xf32>
    %cst_20 = arith.constant dense<0.000000e+00> : vector<32x512xf32>
    %39 = tpu.matmul %0, %38, %cst_20 {dimension_numbers = #tpu.dot_dimension_numbers<[1], [0], [0], [1], [0, 0, 1, 1], [], []>} : vector<32x32xf32>, vector<32x512xf32>, vector<32x512xf32> -> vector<32x512xf32>
    %40 = arith.addf %37, %39 : vector<32x512xf32>
    %c0_21 = arith.constant 0 : index
    %c0_22 = arith.constant 0 : index
    %41 = vector.load %arg9[%c0_21, %c0_22] : memref<1x512xf32, #tpu.memory_space<vmem>>, vector<1x512xf32>
    %42 = vector.broadcast %41 : vector<1x512xf32> to vector<32x512xf32>
    %43 = arith.addf %40, %42 : vector<32x512xf32>
    %44 = vector.extract_strided_slice %43 {offsets = [0, 0], sizes = [32, 128], strides = [1, 1]} : vector<32x512xf32> to vector<32x128xf32>
    %45 = arith.negf %44 : vector<32x128xf32>
    %46 = math.exp %45 : vector<32x128xf32>
    %cst_23 = arith.constant 1.000000e+00 : f32
    %47 = vector.broadcast %cst_23 : f32 to vector<32x128xf32>
    %48 = arith.addf %47, %46 : vector<32x128xf32>
    %49 = arith.divf %47, %48 : vector<32x128xf32>
    %50 = vector.extract_strided_slice %43 {offsets = [0, 128], sizes = [32, 128], strides = [1, 1]} : vector<32x512xf32> to vector<32x128xf32>
    %51 = arith.negf %50 : vector<32x128xf32>
    %52 = math.exp %51 : vector<32x128xf32>
    %cst_24 = arith.constant 1.000000e+00 : f32
    %53 = vector.broadcast %cst_24 : f32 to vector<32x128xf32>
    %54 = arith.addf %53, %52 : vector<32x128xf32>
    %55 = arith.divf %53, %54 : vector<32x128xf32>
    %56 = vector.extract_strided_slice %43 {offsets = [0, 256], sizes = [32, 128], strides = [1, 1]} : vector<32x512xf32> to vector<32x128xf32>
    %57 = math.tanh %56 : vector<32x128xf32>
    %58 = vector.extract_strided_slice %43 {offsets = [0, 384], sizes = [32, 128], strides = [1, 1]} : vector<32x512xf32> to vector<32x128xf32>
    %59 = arith.negf %58 : vector<32x128xf32>
    %60 = math.exp %59 : vector<32x128xf32>
    %cst_25 = arith.constant 1.000000e+00 : f32
    %61 = vector.broadcast %cst_25 : f32 to vector<32x128xf32>
    %62 = arith.addf %61, %60 : vector<32x128xf32>
    %63 = arith.divf %61, %62 : vector<32x128xf32>
    %64 = arith.mulf %55, %1 : vector<32x128xf32>
    %65 = arith.mulf %49, %57 : vector<32x128xf32>
    %66 = arith.addf %64, %65 : vector<32x128xf32>
    %67 = math.tanh %66 : vector<32x128xf32>
    %68 = arith.mulf %63, %67 : vector<32x128xf32>
    %c0_26 = arith.constant 0 : index
    %c0_27 = arith.constant 0 : index
    %69 = vector.load %arg10[%c0_26, %c0_27] : memref<32x128xf32, #tpu.memory_space<vmem>>, vector<32x128xf32>
    tpu.vector_store %arg10[%c0_26, %c0_27], %68 {strides = array<i32>} : memref<32x128xf32, #tpu.memory_space<vmem>>, vector<32x128xf32>,
    return
  }
  func.func @transform_0(%arg0: i32) -> (i32, i32) {
    %c0_i32 = arith.constant 0 : i32
    %c0_i32_0 = arith.constant 0 : i32
    return %arg0, %c0_i32 : i32, i32
  }
  func.func @transform_1(%arg0: i32) -> (i32, i32) {
    %c0_i32 = arith.constant 0 : i32
    %c0_i32_0 = arith.constant 0 : i32
    return %arg0, %c0_i32 : i32, i32
  }
  func.func @transform_2(%arg0: i32) -> (i32, i32) {
    %c0_i32 = arith.constant 0 : i32
    %c0_i32_0 = arith.constant 0 : i32
    return %arg0, %c0_i32 : i32, i32
  }
  func.func @transform_3(%arg0: i32) -> (i32, i32) {
    %c0_i32 = arith.constant 0 : i32
    %c0_i32_0 = arith.constant 0 : i32
    %c0_i32_1 = arith.constant 0 : i32
    return %c0_i32, %c0_i32_0 : i32, i32
  }
  func.func @transform_4(%arg0: i32) -> (i32, i32) {
    %c0_i32 = arith.constant 0 : i32
    %c0_i32_0 = arith.constant 0 : i32
    %c0_i32_1 = arith.constant 0 : i32
    return %c0_i32, %c0_i32_0 : i32, i32
  }
  func.func @transform_5(%arg0: i32) -> (i32, i32) {
    %c0_i32 = arith.constant 0 : i32
    %c0_i32_0 = arith.constant 0 : i32
    %c0_i32_1 = arith.constant 0 : i32
    return %c0_i32, %c0_i32_0 : i32, i32
  }
  func.func @transform_6(%arg0: i32) -> (i32, i32) {
    %c0_i32 = arith.constant 0 : i32
    %c0_i32_0 = arith.constant 0 : i32
    %c0_i32_1 = arith.constant 0 : i32
    return %c0_i32, %c0_i32_0 : i32, i32
  }
  func.func @transform_7(%arg0: i32) -> (i32, i32) {
    %c0_i32 = arith.constant 0 : i32
    %c0_i32_0 = arith.constant 0 : i32
    %c0_i32_1 = arith.constant 0 : i32
    return %c0_i32, %c0_i32_0 : i32, i32
  }
  func.func @transform_8(%arg0: i32) -> (i32, i32) {
    %c0_i32 = arith.constant 0 : i32
    %c0_i32_0 = arith.constant 0 : i32
    %c0_i32_1 = arith.constant 0 : i32
    return %c0_i32, %c0_i32_0 : i32, i32
  }
  func.func @transform_9(%arg0: i32) -> (i32, i32) {
    %c0_i32 = arith.constant 0 : i32
    %c0_i32_0 = arith.constant 0 : i32
    return %arg0, %c0_i32 : i32, i32
  }
}

</mosaic_0001>

<bundles_post_ra>
// kernel: tpu_custom_call.1
= control target key start
LH: loop header
LB: loop body
LE: loop exit
PB: predicated region body
PF: predicated region fallthrough
CT: control target
= control target key end

     0   :  { %14 = vsyncpa [#allocation3], 0  ;;  %s2152_s0 = inlined_call_operand.hbm [shape: f32[32,32], index: 0, kind: input, shape index: {}]   ;;  %s2153_s1 = inlined_call_operand.hbm [shape: f32[32,32], index: 1, kind: input, shape index: {}]   ;;  %s2154_s2 = inlined_call_operand.hbm [shape: f32[32,128], index: 2, kind: input, shape index: {}]   ;;  %s2155_s3 = inlined_call_operand.hbm [shape: f32[32,512], index: 3, kind: input, shape index: {}]   ;;  %s2156_s4 = inlined_call_operand.hbm [shape: f32[32,512], index: 4, kind: input, shape index: {}]   ;;  %s2157_s5 = inlined_call_operand.vmem [shape: f32[1,512], index: 5, kind: input, shape index: {}]   ;;  %s2158_s6 = inlined_call_operand.hbm [shape: f32[128,512], index: 6, kind: input, shape index: {}]   ;;  %s2159_s7 = inlined_call_operand.hbm [shape: f32[32,512], index: 7, kind: input, shape index: {}]   ;;  %s2160_s8 = inlined_call_operand.vmem [shape: f32[1,512], index: 8, kind: input, shape index: {}]   ;;  %s2161_s9 = inlined_call_operand.hbm [shape: f32[32,128], index: 9, kind: output, shape index: {}]  }
   0x1   :  { %15 = vsyncpa [#allocation6], 0 }
   0x2   :  { %16 = vsyncpa [#allocation9], 0 }
   0x3   :  { %17 = vsyncpa [#allocation12], 0 }
   0x4   :  { %18 = vsyncpa [#allocation4], 0  ;;  %s1800_s30 = smov [#allocation5]   ;;  %s1801_s11 = smov [#allocation8]  }
   0x5   :  { %s36_s10 = sshll.u32 %s1800_s30, 4  ;;  %s60_s12 = sshll.u32 %s1801_s11, 4  ;;  %s37_s10 = int_to_ptr.vmem [resolvable:$true] %s36_s10  ;;  %s1863_s12 = int_to_ptr.vmem [resolvable:$true] %s60_s12 }
   0x6   :  { %s1614_s15 = scalar_lea.hbm %s2153_s1, 512 }
   0x7   :  { %p1615_p0 = scmp.ne.s32.totalorder %s2153_s1, %s1614_s15  ;;  %p1618_p1 = scmp.lt.u32.totalorder %s1614_s15, %s2153_s1 }
   0x9   :  { %p1620_p2 = pnand %p1618_p1, %p1615_p0 }
   0xb   :  { %1623 = shalt.err (!%p1620_p2)
}
   0xc   :  { %s1624_s20 = scalar_lea.vmem %s37_s10, 512  ;;  %p1629_p4 = scmp.lt.s32.totalorder %s37_s10, %s37_s10 }
   0xd   :  { %p1625_p3 = scmp.ne.s32.totalorder %s37_s10, %s1624_s20  ;;  %p1630_p5 = scmp.lt.s32.totalorder %s1624_s20, %s1624_s20 }
   0xf   :  { %p1631_p6 = por %p1630_p5, %p1629_p4 }
  0x11   :  { %p1632_p7 = pnand %p1631_p6, %p1625_p3 }
  0x13   :  { %1635 = shalt.err (!%p1632_p7)
}
  0x14   :  { %s1802_s21 = smov 128   ;;  %s1803_s22 = smov 8  }
  0x15   :  { %42 = dma.hbm_to_vmem [thread:$0]  %s2153_s1, 512, %s37_s10, [#allocation6], %s1802_s21, %s1802_s21, %s1803_s22  }
  0x16   :  { %s1636_s27 = scalar_lea.hbm %s2155_s3, 2048 }
  0x17   :  { %p1637_p8 = scmp.ne.s32.totalorder %s2155_s3, %s1636_s27  ;;  %p1640_p9 = scmp.lt.u32.totalorder %s1636_s27, %s2155_s3 }
  0x19   :  { %p1642_p10 = pnand %p1640_p9, %p1637_p8 }
  0x1b   :  { %1645 = shalt.err (!%p1642_p10)
}
  0x1c   :  { %s1646_s13 = scalar_lea.vmem %s1863_s12, 2048  ;;  %p1651_p12 = scmp.lt.s32.totalorder %s1863_s12, %s1863_s12 }
  0x1d   :  { %p1647_p11 = scmp.ne.s32.totalorder %s1863_s12, %s1646_s13  ;;  %p1652_p13 = scmp.lt.s32.totalorder %s1646_s13, %s1646_s13 }
  0x1f   :  { %p1653_p0 = por %p1652_p13, %p1651_p12 }
  0x21   :  { %p1654_p1 = pnand %p1653_p0, %p1647_p11 }
  0x23   :  { %1657 = shalt.err (!%p1654_p1)
}
  0x24   :  { %s1804_s1 = smov 512   ;;  %s1805_s10 = smov 32  }
  0x25   :  { %66 = dma.hbm_to_vmem [thread:$0]  %s2155_s3, 2048, %s1863_s12, [#allocation9], %s1804_s1, %s1804_s1, %s1805_s10  }
  0x26   :  { %s1806_s16 = smov [#allocation11]   ;;  %s1807_s18 = smov [#allocation2]  }
  0x27   :  { %s86_s17 = sshll.u32 %s1806_s16, 4  ;;  %s24_s19 = sshll.u32 %s1807_s18, 4  ;;  %s87_s17 = int_to_ptr.vmem [resolvable:$true] %s86_s17  ;;  %s1900_s19 = int_to_ptr.vmem [resolvable:$true] %s24_s19 }
  0x28   :  { %s1658_s24 = scalar_lea.hbm %s2158_s6, 8192 }
  0x29   :  { %p1659_p2 = scmp.ne.s32.totalorder %s2158_s6, %s1658_s24  ;;  %p1662_p3 = scmp.lt.u32.totalorder %s1658_s24, %s2158_s6 }
  0x2b   :  { %p1664_p4 = pnand %p1662_p3, %p1659_p2 }
  0x2d   :  { %1667 = shalt.err (!%p1664_p4)
}
  0x2e   :  { %s1668_s3 = scalar_lea.vmem %s87_s17, 8192  ;;  %p1673_p6 = scmp.lt.s32.totalorder %s87_s17, %s87_s17 }
  0x2f   :  { %p1669_p5 = scmp.ne.s32.totalorder %s87_s17, %s1668_s3  ;;  %p1674_p7 = scmp.lt.s32.totalorder %s1668_s3, %s1668_s3 }
  0x31   :  { %p1675_p8 = por %p1674_p7, %p1673_p6 }
  0x33   :  { %p1676_p9 = pnand %p1675_p8, %p1669_p5 }
  0x35   :  { %1679 = shalt.err (!%p1676_p9)
}
  0x36   :  { %92 = dma.hbm_to_vmem [thread:$0]  %s2158_s6, 8192, %s87_s17, [#allocation12], %s1804_s1, %s1804_s1, %s1805_s10  }
  0x37   :  { %s1680_s13 = scalar_lea.hbm %s2152_s0, 512 }
  0x38   :  { %p1681_p10 = scmp.ne.s32.totalorder %s2152_s0, %s1680_s13  ;;  %p1684_p11 = scmp.lt.u32.totalorder %s1680_s13, %s2152_s0 }
  0x3a   :  { %p1686_p12 = pnand %p1684_p11, %p1681_p10 }
  0x3c   :  { %1689 = shalt.err (!%p1686_p12)
}
  0x3d   :  { %s1690_s20 = scalar_lea.vmem %s1900_s19, 512  ;;  %p1695_p0 = scmp.lt.s32.totalorder %s1900_s19, %s1900_s19 }
  0x3e   :  { %p1691_p13 = scmp.ne.s32.totalorder %s1900_s19, %s1690_s20  ;;  %p1696_p1 = scmp.lt.s32.totalorder %s1690_s20, %s1690_s20 }
  0x40   :  { %p1697_p2 = por %p1696_p1, %p1695_p0 }
  0x42   :  { %p1698_p3 = pnand %p1697_p2, %p1691_p13 }
  0x44   :  { %1701 = shalt.err (!%p1698_p3)
}
  0x45   :  { %30 = dma.hbm_to_vmem [thread:$0]  %s2152_s0, 512, %s1900_s19, [#allocation3], %s1802_s21, %s1802_s21, %s1803_s22  }
  0x46   :  { %s1808_s23 = smov [#allocation7]   ;;  %s1809_s25 = smov [#allocation10]  }
  0x47   :  { %s48_s24 = sshll.u32 %s1808_s23, 4  ;;  %s72_s26 = sshll.u32 %s1809_s25, 4  ;;  %s49_s24 = int_to_ptr.vmem [resolvable:$true] %s48_s24  ;;  %s1937_s26 = int_to_ptr.vmem [resolvable:$true] %s72_s26 }
  0x48   :  { %s1702_s3 = scalar_lea.hbm %s2154_s2, 512 }
  0x49   :  { %p1703_p4 = scmp.ne.s32.totalorder %s2154_s2, %s1702_s3  ;;  %p1706_p5 = scmp.lt.u32.totalorder %s1702_s3, %s2154_s2 }
  0x4b   :  { %p1708_p6 = pnand %p1706_p5, %p1703_p4 }
  0x4d   :  { %1711 = shalt.err (!%p1708_p6)
}
  0x4e   :  { %s1712_s0 = scalar_lea.vmem %s49_s24, 512  ;;  %p1717_p8 = scmp.lt.s32.totalorder %s49_s24, %s49_s24 }
  0x4f   :  { %p1713_p7 = scmp.ne.s32.totalorder %s49_s24, %s1712_s0  ;;  %p1718_p9 = scmp.lt.s32.totalorder %s1712_s0, %s1712_s0 }
  0x51   :  { %p1719_p10 = por %p1718_p9, %p1717_p8 }
  0x53   :  { %p1720_p11 = pnand %p1719_p10, %p1713_p7 }
  0x55   :  { %1723 = shalt.err (!%p1720_p11)
}
  0x56   :  { %54 = dma.hbm_to_vmem [thread:$0]  %s2154_s2, 512, %s49_s24, [#allocation6], %s1802_s21, %s1802_s21, %s1803_s22  }
  0x57   :  { %s1724_s16 = scalar_lea.hbm %s2156_s4, 2048 }
  0x58   :  { %p1725_p12 = scmp.ne.s32.totalorder %s2156_s4, %s1724_s16  ;;  %p1728_p13 = scmp.lt.u32.totalorder %s1724_s16, %s2156_s4 }
  0x5a   :  { %p1730_p0 = pnand %p1728_p13, %p1725_p12 }
  0x5c   :  { %1733 = shalt.err (!%p1730_p0)
}
  0x5d   :  { %s1734_s23 = scalar_lea.vmem %s1937_s26, 2048  ;;  %p1739_p2 = scmp.lt.s32.totalorder %s1937_s26, %s1937_s26 }
  0x5e   :  { %p1735_p1 = scmp.ne.s32.totalorder %s1937_s26, %s1734_s23  ;;  %p1740_p3 = scmp.lt.s32.totalorder %s1734_s23, %s1734_s23 }
  0x60   :  { %p1741_p4 = por %p1740_p3, %p1739_p2 }
  0x62   :  { %p1742_p5 = pnand %p1741_p4, %p1735_p1 }
  0x64   :  { %1745 = shalt.err (!%p1742_p5)
}
  0x65   :  { %78 = dma.hbm_to_vmem [thread:$0]  %s2156_s4, 2048, %s1937_s26, [#allocation9], %s1804_s1, %s1804_s1, %s1805_s10  }
  0x66   :  { %s1810_s25 = smov [#allocation13]   ;;  %s1746_s12 = scalar_lea.hbm %s2159_s7, 2048 }
  0x67   :  { %s98_s27 = sshll.u32 %s1810_s25, 4  ;;  %p1747_p6 = scmp.ne.s32.totalorder %s2159_s7, %s1746_s12  ;;  %s99_s27 = int_to_ptr.vmem [resolvable:$true] %s98_s27 }
  0x68   :  { %p1750_p7 = scmp.lt.u32.totalorder %s1746_s12, %s2159_s7 }
  0x6a   :  { %p1752_p8 = pnand %p1750_p7, %p1747_p6 }
  0x6c   :  { %1755 = shalt.err (!%p1752_p8)
}
  0x6d   :  { %s1756_s19 = scalar_lea.vmem %s99_s27, 2048  ;;  %p1761_p10 = scmp.lt.s32.totalorder %s99_s27, %s99_s27 }
  0x6e   :  { %p1757_p9 = scmp.ne.s32.totalorder %s99_s27, %s1756_s19  ;;  %p1762_p11 = scmp.lt.s32.totalorder %s1756_s19, %s1756_s19 }
  0x70   :  { %p1763_p12 = por %p1762_p11, %p1761_p10 }
  0x72   :  { %p1764_p13 = pnand %p1763_p12, %p1757_p9 }
  0x74   :  { %1767 = shalt.err (!%p1764_p13)
}
  0x75   :  { %104 = dma.hbm_to_vmem [thread:$0]  %s2159_s7, 2048, %s99_s27, [#allocation12], %s1804_s1, %s1804_s1, %s1805_s10  }
  0x76   :  { %1790 = dma.done.wait [#allocation3], 512  }
  0x77   :  { %1791 = vsyncadd [#allocation3], 4294966784 }
  0x78   :  { %1792 = dma.done.wait [#allocation6], 1024  }
  0x79   :  { %1793 = vsyncadd [#allocation6], 4294966272 }
  0x7a   :  { %1794 = dma.done.wait [#allocation9], 4096  }
  0x7b   :  { %1795 = vsyncadd [#allocation9], 4294963200 }
  0x7c   :  { %1796 = dma.done.wait [#allocation12], 10240  }
  0x7d   :  { %1797 = vsyncadd [#allocation12], 4294957056  ;;  %v1811_v0 = vmov 0.0   ;;  %v157_v1 = vld [vmem:[#allocation10 + $0x8] sm:$0xff]  ;;  %v159_v3 = vld [vmem:[#allocation10 + $0x18] sm:$0xff]  ;;  %vm172_vm0 = vcmask 261120  }
  0x7e   :  { %249 = vmatprep.mubr.f32.mxu0 %v1811_v0  ;;  %338 = vmatprep.mubr.f32.mxu1 %v1811_v0  ;;  %v161_v2 = vld [vmem:[#allocation10 + $0x28] sm:$0xff]  ;;  %v163_v5 = vld [vmem:[#allocation10 + $0x38] sm:$0xff]  ;;  %v156_v6 = vld [vmem:[#allocation10] sm:$0xff] }
  0x7f   :  { %v1329_v4 = vpack.c.bf16 %v161_v2, %v157_v1  ;;  %v160_v7 = vld [vmem:[#allocation10 + $0x20] sm:$0xff]  ;;  %v1337_v8 = vpack.c.bf16 %v163_v5, %v159_v3  ;;  %v158_v10 = vld [vmem:[#allocation10 + $0x10] sm:$0xff]  ;;  %v165_v12 = vld [vmem:[#allocation10 + $0x48] sm:$0xff] }
  0x80   :  { %v1331_v9 = vpack.c.bf16 %v160_v7, %v156_v6  ;;  %v162_v11 = vld [vmem:[#allocation10 + $0x30] sm:$0xff]  ;;  %v169_v14 = vld [vmem:[#allocation10 + $0x68] sm:$0xff]  ;;  %v167_v15 = vld [vmem:[#allocation10 + $0x58] sm:$0xff] }
  0x81   :  { %1330 = vmatprep.subr.bf16.mxu0 %v1329_v4  ;;  %v1339_v13 = vpack.c.bf16 %v162_v11, %v158_v10  ;;  %v171_v16 = vld [vmem:[#allocation10 + $0x78] sm:$0xff]  ;;  %1338 = vmatprep.subr.bf16.mxu1 %v1337_v8  ;;  %v1333_v17 = vpack.c.bf16 %v169_v14, %v165_v12  ;;  %v164_v19 = vld [vmem:[#allocation10 + $0x40] sm:$0xff]  ;;  %v166_v21 = vld [vmem:[#allocation10 + $0x50] sm:$0xff] }
  0x82   :  { %1332 = vmatpush1.bf16.msra.mxu0 %v1331_v9  ;;  %v1341_v18 = vpack.c.bf16 %v171_v16, %v167_v15  ;;  %v168_v20 = vld [vmem:[#allocation10 + $0x60] sm:$0xff]  ;;  %v170_v23 = vld [vmem:[#allocation10 + $0x70] sm:$0xff]  ;;  %v141_v24 = vld [vmem:[#allocation8 + $0x8] sm:$0xff] }
  0x83   :  { %1340 = vmatpush1.bf16.msra.mxu1 %v1339_v13  ;;  %v1335_v22 = vpack.c.bf16 %v168_v20, %v164_v19  ;;  %1334 = vmatprep.subr.bf16.mxu0 %v1333_v17  ;;  %v1343_v25 = vpack.c.bf16 %v170_v23, %v166_v21  ;;  %v145_v26 = vld [vmem:[#allocation8 + $0x28] sm:$0xff]  ;;  %v140_v27 = vld [vmem:[#allocation8] sm:$0xff]  ;;  %v143_v34 = vld [vmem:[#allocation8 + $0x18] sm:$0xff] }
  0x84   :  { %1342 = vmatprep.subr.bf16.mxu1 %v1341_v18  ;;  %v144_v28 = vld [vmem:[#allocation8 + $0x20] sm:$0xff]  ;;  %v1345_v30 = vpack.c.bf16 %v145_v26, %v141_v24  ;;  %v149_v31 = vld [vmem:[#allocation8 + $0x48] sm:$0xff]  ;;  %v147_v35 = vld [vmem:[#allocation8 + $0x38] sm:$0xff] }
  0x85   :  { %v1991_v29 = vld [vmem:[#allocation5] sm:$0xff]  ;;  %v1347_v32 = vpack.c.bf16 %v144_v28, %v140_v27  ;;  %v153_v33 = vld [vmem:[#allocation8 + $0x68] sm:$0xff]  ;;  %v1353_v36 = vpack.c.bf16 %v147_v35, %v143_v34  ;;  %v142_v38 = vld [vmem:[#allocation8 + $0x10] sm:$0xff] }
  0x86   :  { %1336 = vmatpush1.bf16.msra.mxu0 %v1335_v22  ;;  %v148_v37 = vld [vmem:[#allocation8 + $0x40] sm:$0xff]  ;;  %v1349_v39 = vpack.c.bf16 %v153_v33, %v149_v31  ;;  %v146_v41 = vld [vmem:[#allocation8 + $0x30] sm:$0xff]  ;;  %v151_v42 = vld [vmem:[#allocation8 + $0x58] sm:$0xff] }
  0x87   :  { %1344 = vmatpush1.bf16.msra.mxu1 %v1343_v25  ;;  %1346 = vmatprep.subr.bf16.mxu0 %v1345_v30  ;;  %v152_v40 = vld [vmem:[#allocation8 + $0x60] sm:$0xff]  ;;  %v1355_v43 = vpack.c.bf16 %v146_v41, %v142_v38  ;;  %v155_v44 = vld [vmem:[#allocation8 + $0x78] sm:$0xff]  ;;  %v150_v45 = vld [vmem:[#allocation8 + $0x50] sm:$0xff] }
  0x88   :  { %1354 = vmatprep.subr.bf16.mxu1 %v1353_v36  ;;  %v154_v46 = vld [vmem:[#allocation8 + $0x70] sm:$0xff]  ;;  %v1997_v47 = vld [vmem:[#allocation5 + $0x8] sm:$0xff]  ;;  %v1357_v48 = vpack.c.bf16 %v155_v44, %v151_v42  ;;  %v1351_v49 = vpack.c.bf16 %v152_v40, %v148_v37  ;;  %v2014_v52 = vld [vmem:[#allocation5 + $0x18] sm:$0xff] }
  0x89   :  { %1281 = vmatmul.mubr.msk.f32.vlgmr.msra.gmra.mrb[0].mxu0 %vm172_vm0, %v1991_v29  ;;  %v1359_v50 = vpack.c.bf16 %v154_v46, %v150_v45  ;;  %v2006_v51 = vld [vmem:[#allocation5 + $0x10] sm:$0xff]  ;;  %v136_v53 = vld [vmem:[#allocation2] sm:$0xff]  ;;  %v137_v54 = vld [vmem:[#allocation2 + $0x8] sm:$0xff] }
  0x8a   :  { %1285 = vmatmul.mubr.msk.f32.vlgmr.msra.gmra.mrb[0].mxu1 %vm172_vm0, %v1991_v29  ;;  %1348 = vmatpush1.bf16.msra.mxu0 %v1347_v32  ;;  %v138_v55 = vld [vmem:[#allocation2 + $0x10] sm:$0xff]  ;;  %v139_v56 = vld [vmem:[#allocation2 + $0x18] sm:$0xff]  ;;  %v752_v57 = vld [vmem:[#allocation13 + $0x8] sm:$0xff] }
  0x8b   :  { %255 = vmatprep.mubr.f32.mxu0 %v1811_v0  ;;  %344 = vmatprep.mubr.f32.mxu1 %v1811_v0  ;;  %v756_v58 = vld [vmem:[#allocation13 + $0x28] sm:$0xff]  ;;  %v754_v59 = vld [vmem:[#allocation13 + $0x18] sm:$0xff]  ;;  %v751_v61 = vld [vmem:[#allocation13] sm:$0xff] }
  0x8c   :  { %1350 = vmatprep.subr.bf16.mxu0 %v1349_v39  ;;  %1356 = vmatpush1.bf16.msra.mxu1 %v1355_v43  ;;  %v1361_v60 = vpack.c.bf16 %v756_v58, %v752_v57  ;;  %v755_v62 = vld [vmem:[#allocation13 + $0x20] sm:$0xff]  ;;  %v758_v63 = vld [vmem:[#allocation13 + $0x38] sm:$0xff]  ;;  %v753_v3 = vld [vmem:[#allocation13 + $0x10] sm:$0xff] }
  0x8d   :  { %1282 = vmatmul.mubr.msk.f32.gmra.mrb[2].mxu0 %vm172_vm0, %v1997_v47  ;;  %1358 = vmatprep.subr.bf16.mxu1 %v1357_v48  ;;  %v1363_v1 = vpack.c.bf16 %v755_v62, %v751_v61  ;;  %v1369_v2 = vpack.c.bf16 %v758_v63, %v754_v59  ;;  %v757_v4 = vld [vmem:[#allocation13 + $0x30] sm:$0xff]  ;;  %v760_v6 = vld [vmem:[#allocation13 + $0x48] sm:$0xff]  ;;  %v762_v8 = vld [vmem:[#allocation13 + $0x58] sm:$0xff] }
  0x8e   :  { %1286 = vmatmul.mubr.msk.f32.gmra.mrb[2].mxu1 %vm172_vm0, %v1997_v47  ;;  %261 = vmatprep.mubr.f32.mxu0 %v1811_v0  ;;  %v1371_v5 = vpack.c.bf16 %v757_v4, %v753_v3  ;;  %v764_v7 = vld [vmem:[#allocation13 + $0x68] sm:$0xff]  ;;  %v759_v10 = vld [vmem:[#allocation13 + $0x40] sm:$0xff]  ;;  %v766_v12 = vld [vmem:[#allocation13 + $0x78] sm:$0xff] }
  0x8f   :  { %350 = vmatprep.mubr.f32.mxu1 %v1811_v0  ;;  %1352 = vmatpush1.bf16.msra.mxu0 %v1351_v49  ;;  %v1365_v9 = vpack.c.bf16 %v764_v7, %v760_v6  ;;  %v763_v11 = vld [vmem:[#allocation13 + $0x60] sm:$0xff]  ;;  %v1373_v14 = vpack.c.bf16 %v766_v12, %v762_v8  ;;  %v761_v15 = vld [vmem:[#allocation13 + $0x50] sm:$0xff]  ;;  %v688_v18 = vld [vmem:[#allocation11 + $0x8] sm:$0xff] }
  0x90   :  { %1360 = vmatpush1.bf16.msra.mxu1 %v1359_v50  ;;  %1362 = vmatprep.subr.bf16.mxu0 %v1361_v60  ;;  %v1367_v13 = vpack.c.bf16 %v763_v11, %v759_v10  ;;  %v765_v16 = vld [vmem:[#allocation13 + $0x70] sm:$0xff]  ;;  %v692_v19 = vld [vmem:[#allocation11 + $0x28] sm:$0xff]  ;;  %v690_v20 = vld [vmem:[#allocation11 + $0x18] sm:$0xff] }
  0x91   :  { %1283 = vmatmul.mubr.msk.f32.gmra.mrb[4].mxu0 %vm172_vm0, %v2006_v51  ;;  %1370 = vmatprep.subr.bf16.mxu1 %v1369_v2  ;;  %v1375_v17 = vpack.c.bf16 %v765_v16, %v761_v15  ;;  %v1377_v21 = vpack.c.bf16 %v692_v19, %v688_v18  ;;  %v694_v22 = vld [vmem:[#allocation11 + $0x38] sm:$0xff]  ;;  %v687_v23 = vld [vmem:[#allocation11] sm:$0xff]  ;;  %v689_v27 = vld [vmem:[#allocation11 + $0x10] sm:$0xff] }
  0x92   :  { %1287 = vmatmul.mubr.msk.f32.gmra.mrb[4].mxu1 %vm172_vm0, %v2006_v51  ;;  %267 = vmatprep.mubr.f32.mxu0 %v1811_v0  ;;  %v691_v24 = vld [vmem:[#allocation11 + $0x20] sm:$0xff]  ;;  %v1409_v25 = vpack.c.bf16 %v694_v22, %v690_v20  ;;  %v693_v28 = vld [vmem:[#allocation11 + $0x30] sm:$0xff]  ;;  %v696_v30 = vld [vmem:[#allocation11 + $0x48] sm:$0xff] }
  0x93   :  { %356 = vmatprep.mubr.f32.mxu1 %v1811_v0  ;;  %v1379_v26 = vpack.c.bf16 %v691_v24, %v687_v23  ;;  %v700_v31 = vld [vmem:[#allocation11 + $0x68] sm:$0xff]  ;;  %v698_v32 = vld [vmem:[#allocation11 + $0x58] sm:$0xff]  ;;  %v695_v35 = vld [vmem:[#allocation11 + $0x40] sm:$0xff] }
  0x94   :  { %v1381_v33 = vpack.c.bf16 %v700_v31, %v696_v30  ;;  %v702_v34 = vld [vmem:[#allocation11 + $0x78] sm:$0xff]  ;;  %v699_v36 = vld [vmem:[#allocation11 + $0x60] sm:$0xff]  ;;  %v697_v39 = vld [vmem:[#allocation11 + $0x50] sm:$0xff] }
  0x95   :  { %1284 = vmatmul.mubr.msk.f32.gmra.mrb[6].mxu0 %vm172_vm0, %v2014_v52  ;;  %v1413_v37 = vpack.c.bf16 %v702_v34, %v698_v32  ;;  %v1383_v38 = vpack.c.bf16 %v699_v36, %v695_v35  ;;  %v701_v40 = vld [vmem:[#allocation11 + $0x70] sm:$0xff]  ;;  %v704_v42 = vld [vmem:[#allocation11 + $0x88] sm:$0xff]  ;;  %v706_v44 = vld [vmem:[#allocation11 + $0x98] sm:$0xff] }
  0x96   :  { %1288 = vmatmul.mubr.msk.f32.gmra.mrb[6].mxu1 %vm172_vm0, %v2014_v52  ;;  %439 = vmatprep.mubr.f32.mxu0 %v1811_v0  ;;  %v1415_v41 = vpack.c.bf16 %v701_v40, %v697_v39  ;;  %v708_v43 = vld [vmem:[#allocation11 + $0xa8] sm:$0xff]  ;;  %v710_v46 = vld [vmem:[#allocation11 + $0xb8] sm:$0xff]  ;;  %v707_v48 = vld [vmem:[#allocation11 + $0xa0] sm:$0xff] }
  0x97   :  { %528 = vmatprep.mubr.f32.mxu1 %v1811_v0  ;;  %v1385_v45 = vpack.c.bf16 %v708_v43, %v704_v42  ;;  %v1417_v49 = vpack.c.bf16 %v710_v46, %v706_v44  ;;  %v714_v57 = vld [vmem:[#allocation11 + $0xd8] sm:$0xff]  ;;  %v711_v60 = vld [vmem:[#allocation11 + $0xc0] sm:$0xff]  ;;  %v720_v3 = vld [vmem:[#allocation11 + $0x108] sm:$0xff] }
  0x98   :  { %v718_v59 = vld [vmem:[#allocation11 + $0xf8] sm:$0xff]  ;;  %v715_v61 = vld [vmem:[#allocation11 + $0xe0] sm:$0xff]  ;;  %v724_v4 = vld [vmem:[#allocation11 + $0x128] sm:$0xff] }
  0x99   :  { %1289 = vmatmul.mubr.msk.f32.vlgmr.msra.gmra.mrb[0].mxu0 %vm172_vm0, %v136_v53  ;;  %v1421_v62 = vpack.c.bf16 %v718_v59, %v714_v57  ;;  %v1391_v63 = vpack.c.bf16 %v715_v61, %v711_v60  ;;  %v1393_v6 = vpack.c.bf16 %v724_v4, %v720_v3  ;;  %v726_v7 = vld [vmem:[#allocation11 + $0x138] sm:$0xff]  ;;  %v719_v8 = vld [vmem:[#allocation11 + $0x100] sm:$0xff]  ;;  %v721_v12 = vld [vmem:[#allocation11 + $0x110] sm:$0xff] }
  0x9a   :  { %1293 = vmatmul.mubr.msk.f32.vlgmr.msra.gmra.mrb[0].mxu1 %vm172_vm0, %v136_v53  ;;  %445 = vmatprep.mubr.f32.mxu0 %v1811_v0  ;;  %v709_v53 = vld [vmem:[#allocation11 + $0xb0] sm:$0xff]  ;;  %v728_v15 = vld [vmem:[#allocation11 + $0x148] sm:$0xff]  ;;  %v734_v19 = vld [vmem:[#allocation11 + $0x178] sm:$0xff] }
  0x9b   :  { %534 = vmatprep.mubr.f32.mxu1 %v1811_v0  ;;  %1364 = vmatpush1.bf16.msra.mxu0 %v1363_v1  ;;  %v713_v1 = vld [vmem:[#allocation11 + $0xd0] sm:$0xff]  ;;  %v732_v16 = vld [vmem:[#allocation11 + $0x168] sm:$0xff]  ;;  %v727_v20 = vld [vmem:[#allocation11 + $0x140] sm:$0xff] }
  0x9c   :  { %1372 = vmatpush1.bf16.msra.mxu1 %v1371_v5  ;;  %1366 = vmatprep.subr.bf16.mxu0 %v1365_v9  ;;  %v722_v5 = vld [vmem:[#allocation11 + $0x118] sm:$0xff]  ;;  %v723_v9 = vld [vmem:[#allocation11 + $0x120] sm:$0xff]  ;;  %v1397_v18 = vpack.c.bf16 %v732_v16, %v728_v15  ;;  %v729_v24 = vld [vmem:[#allocation11 + $0x150] sm:$0xff] }
  0x9d   :  { %1290 = vmatmul.mubr.msk.f32.gmra.mrb[2].mxu0 %vm172_vm0, %v137_v54  ;;  %1374 = vmatprep.subr.bf16.mxu1 %v1373_v14  ;;  %v1425_v10 = vpack.c.bf16 %v726_v7, %v722_v5  ;;  %v1395_v11 = vpack.c.bf16 %v723_v9, %v719_v8  ;;  %v742_v31 = vld [vmem:[#allocation11 + $0x1b8] sm:$0xff]  ;;  %v735_v32 = vld [vmem:[#allocation11 + $0x180] sm:$0xff]  ;;  %v737_v36 = vld [vmem:[#allocation11 + $0x190] sm:$0xff] }
  0x9e   :  { %1294 = vmatmul.mubr.msk.f32.gmra.mrb[2].mxu1 %vm172_vm0, %v137_v54  ;;  %451 = vmatprep.mubr.f32.mxu0 %v1811_v0  ;;  %v744_v39 = vld [vmem:[#allocation11 + $0x1c8] sm:$0xff]  ;;  %v750_v43 = vld [vmem:[#allocation11 + $0x1f8] sm:$0xff]  ;;  %v743_v44 = vld [vmem:[#allocation11 + $0x1c0] sm:$0xff] }
  0x9f   :  { %540 = vmatprep.mubr.f32.mxu1 %v1811_v0  ;;  %1368 = vmatpush1.bf16.msra.mxu0 %v1367_v13  ;;  %v725_v13 = vld [vmem:[#allocation11 + $0x130] sm:$0xff]  ;;  %v748_v40 = vld [vmem:[#allocation11 + $0x1e8] sm:$0xff] }
  0xa0   :  { %1376 = vmatpush1.bf16.msra.mxu1 %v1375_v17  ;;  %1378 = vmatprep.subr.bf16.mxu0 %v1377_v21  ;;  %v1427_v14 = vpack.c.bf16 %v725_v13, %v721_v12  ;;  %v730_v17 = vld [vmem:[#allocation11 + $0x158] sm:$0xff]  ;;  %v731_v21 = vld [vmem:[#allocation11 + $0x160] sm:$0xff]  ;;  %v1405_v42 = vpack.c.bf16 %v748_v40, %v744_v39 }
  0xa1   :  { %1291 = vmatmul.mubr.msk.f32.gmra.mrb[4].mxu0 %vm172_vm0, %v138_v55  ;;  %1410 = vmatprep.subr.bf16.mxu1 %v1409_v25  ;;  %v1429_v22 = vpack.c.bf16 %v734_v19, %v730_v17  ;;  %v1399_v23 = vpack.c.bf16 %v731_v21, %v727_v20  ;;  %v733_v25 = vld [vmem:[#allocation11 + $0x170] sm:$0xff] }
  0xa2   :  { %1295 = vmatmul.mubr.msk.f32.gmra.mrb[4].mxu1 %vm172_vm0, %v138_v55  ;;  %457 = vmatprep.mubr.f32.mxu0 %v1811_v0  ;;  %v712_v55 = vld [vmem:[#allocation11 + $0xc8] sm:$0xff] }
  0xa3   :  { %546 = vmatprep.mubr.f32.mxu1 %v1811_v0 }
  0xa5   :  { %1292 = vmatmul.mubr.msk.f32.gmra.mrb[6].mxu0 %vm172_vm0, %v139_v56 }
  0xa6   :  { %1296 = vmatmul.mubr.msk.f32.gmra.mrb[6].mxu1 %vm172_vm0, %v139_v56  ;;  %831 = vmatprep.mubr.f32.mxu0 %v1811_v0  ;;  %v716_v56 = vld [vmem:[#allocation11 + $0xe8] sm:$0xff] }
  0xa7   :  { %920 = vmatprep.mubr.f32.mxu1 %v1811_v0  ;;  %v1389_v58 = vpack.c.bf16 %v716_v56, %v712_v55  ;;  %v553_v55 = vld [vmem:[%s2157_s5] sm:$0xf] }
  0xa9   :  { %1309 = vmatmul.mubr.msk.f32.vlgmr.msra.gmra.mrb[8].mxu0 %vm172_vm0, %v1991_v29 }
  0xaa   :  { %1313 = vmatmul.mubr.msk.f32.vlgmr.msra.gmra.mrb[8].mxu1 %vm172_vm0, %v1991_v29  ;;  %837 = vmatprep.mubr.f32.mxu0 %v1811_v0  ;;  %v1411_v29 = vpack.c.bf16 %v693_v28, %v689_v27  ;;  %v736_v27 = vld [vmem:[#allocation11 + $0x188] sm:$0xff] }
  0xab   :  { %926 = vmatprep.mubr.f32.mxu1 %v1811_v0  ;;  %1380 = vmatpush1.bf16.msra.mxu0 %v1379_v26  ;;  %v1431_v26 = vpack.c.bf16 %v733_v25, %v729_v24  ;;  %v740_v28 = vld [vmem:[#allocation11 + $0x1a8] sm:$0xff] }
  0xac   :  { %1412 = vmatpush1.bf16.msra.mxu1 %v1411_v29  ;;  %1382 = vmatprep.subr.bf16.mxu0 %v1381_v33  ;;  %v738_v29 = vld [vmem:[#allocation11 + $0x198] sm:$0xff]  ;;  %v1401_v30 = vpack.c.bf16 %v740_v28, %v736_v27  ;;  %v739_v33 = vld [vmem:[#allocation11 + $0x1a0] sm:$0xff] }
  0xad   :  { %1310 = vmatmul.mubr.msk.f32.gmra.mrb[10].mxu0 %vm172_vm0, %v1997_v47  ;;  %1414 = vmatprep.subr.bf16.mxu1 %v1413_v37  ;;  %v1433_v34 = vpack.c.bf16 %v742_v31, %v738_v29  ;;  %v1403_v35 = vpack.c.bf16 %v739_v33, %v735_v32  ;;  %v741_v37 = vld [vmem:[#allocation11 + $0x1b0] sm:$0xff] }
  0xae   :  { %1314 = vmatmul.mubr.msk.f32.gmra.mrb[10].mxu1 %vm172_vm0, %v1997_v47  ;;  %843 = vmatprep.mubr.f32.mxu0 %v1811_v0  ;;  %v703_v47 = vld [vmem:[#allocation11 + $0x80] sm:$0xff] }
  0xaf   :  { %932 = vmatprep.mubr.f32.mxu1 %v1811_v0  ;;  %1384 = vmatpush1.bf16.msra.mxu0 %v1383_v38  ;;  %v1387_v50 = vpack.c.bf16 %v707_v48, %v703_v47  ;;  %v1435_v38 = vpack.c.bf16 %v741_v37, %v737_v36  ;;  %v745_v48 = vld [vmem:[#allocation11 + $0x1d0] sm:$0xff] }
  0xb0   :  { %1416 = vmatpush1.bf16.msra.mxu1 %v1415_v41  ;;  %1386 = vmatprep.subr.bf16.mxu0 %v1385_v45  ;;  %v746_v41 = vld [vmem:[#allocation11 + $0x1d8] sm:$0xff]  ;;  %v747_v45 = vld [vmem:[#allocation11 + $0x1e0] sm:$0xff] }
  0xb1   :  { %1311 = vmatmul.mubr.msk.f32.gmra.mrb[12].mxu0 %vm172_vm0, %v2006_v51  ;;  %1418 = vmatprep.subr.bf16.mxu1 %v1417_v49  ;;  %v1437_v46 = vpack.c.bf16 %v750_v43, %v746_v41  ;;  %v1407_v47 = vpack.c.bf16 %v747_v45, %v743_v44  ;;  %v749_v49 = vld [vmem:[#allocation11 + $0x1f0] sm:$0xff] }
  0xb2   :  { %1315 = vmatmul.mubr.msk.f32.gmra.mrb[12].mxu1 %vm172_vm0, %v2006_v51  ;;  %849 = vmatprep.mubr.f32.mxu0 %v1811_v0  ;;  %v705_v51 = vld [vmem:[#allocation11 + $0x90] sm:$0xff] }
  0xb3   :  { %938 = vmatprep.mubr.f32.mxu1 %v1811_v0  ;;  %v1419_v54 = vpack.c.bf16 %v709_v53, %v705_v51  ;;  %1388 = vmatpush1.bf16.msra.mxu0 %v1387_v50  ;;  %v1439_v50 = vpack.c.bf16 %v749_v49, %v745_v48  ;;  %v555_v51 = vlaneseq }
  0xb4   :  { %1390 = vmatprep.subr.bf16.mxu0 %v1389_v58 }
  0xb5   :  { %1312 = vmatmul.mubr.msk.f32.gmra.mrb[14].mxu0 %vm172_vm0, %v2014_v52  ;;  %1420 = vmatpush1.bf16.msra.mxu1 %v1419_v54  ;;  %v2063_v53 = vshrl.u32 %v555_v51, 7 }
  0xb6   :  { %1316 = vmatmul.mubr.msk.f32.gmra.mrb[14].mxu1 %vm172_vm0, %v2014_v52  ;;  %1009 = vmatprep.mubr.f32.mxu0 %v1811_v0  ;;  %v717_v52 = vld [vmem:[#allocation11 + $0xf0] sm:$0xff] }
  0xb7   :  { %1098 = vmatprep.mubr.f32.mxu1 %v1811_v0  ;;  %v1423_v2 = vpack.c.bf16 %v717_v52, %v713_v1  ;;  %1422 = vmatprep.subr.bf16.mxu1 %v1421_v62  ;;  %v557_v54 = vsub.s32 0, %v2063_v53  ;;  %v561_v56 = vsub.s32 1, %v2063_v53  ;;  %v569_v59 = vsub.s32 3, %v2063_v53 }
  0xb8   :  { %1392 = vmatpush1.bf16.msra.mxu0 %v1391_v63  ;;  %v565_v61 = vsub.s32 2, %v2063_v53 }
  0xb9   :  { %1424 = vmatpush1.bf16.msra.mxu1 %v1423_v2  ;;  %1394 = vmatprep.subr.bf16.mxu0 %v1393_v6  ;;  %v558_v57 = vrot.slane %v553_v55, %v557_v54  ;;  %v562_v58 = vrot.slane %v553_v55, %v561_v56  ;;  %v2078_v4 = vrot.slane %v553_v55, %v569_v59 }
  0xba   :  { %1426 = vmatprep.subr.bf16.mxu1 %v1425_v10  ;;  %v2082_v5 = vrot.slane %v553_v55, %v565_v61 }
  0xbc   :  { %1396 = vmatpush1.bf16.msra.mxu0 %v1395_v11 }
  0xbd   :  { %1428 = vmatpush1.bf16.msra.mxu1 %v1427_v14  ;;  %1398 = vmatprep.subr.bf16.mxu0 %v1397_v18 }
  0xbe   :  { %1430 = vmatprep.subr.bf16.mxu1 %v1429_v22 }
  0xc0   :  { %1400 = vmatpush1.bf16.msra.mxu0 %v1399_v23 }
  0xc1   :  { %1432 = vmatpush1.bf16.msra.mxu1 %v1431_v26  ;;  %1402 = vmatprep.subr.bf16.mxu0 %v1401_v30 }
  0xc2   :  { %1434 = vmatprep.subr.bf16.mxu1 %v1433_v34 }
  0xc4   :  { %1404 = vmatpush1.bf16.msra.mxu0 %v1403_v35 }
  0xc5   :  { %1436 = vmatpush1.bf16.msra.mxu1 %v1435_v38  ;;  %1406 = vmatprep.subr.bf16.mxu0 %v1405_v42 }
  0xc6   :  { %1438 = vmatprep.subr.bf16.mxu1 %v1437_v46 }
  0xc8   :  { %1408 = vmatpush1.bf16.msra.mxu0 %v1407_v47 }
  0xc9   :  { %1440 = vmatpush1.bf16.msra.mxu1 %v1439_v50 }
 0x16c   :  { %v441_v60 = vpop.f32.mrb[0].mxu0 }
 0x16d   :  { %v575_v62 = vadd.f32 %v558_v57, %v441_v60  ;;  %v530_v63 = vpop.f32.mrb[0].mxu1  ;;  %v443_v1 = vpop.f32.mrb[1].mxu0 }
 0x16e   :  { %v576_v52 = vadd.f32 %v562_v58, %v443_v1  ;;  %v532_v2 = vpop.f32.mrb[1].mxu1  ;;  %v577_v15 = vadd.f32 %v2082_v5, %v530_v63  ;;  %v2092_v1 = vld [vmem:[#allocation7] sm:$0xff] }
 0x16f   :  { %v1297_v3 = vmul.f32 -1.442695, %v575_v62  ;;  %v578_v13 = vadd.f32 %v2078_v4, %v532_v2 }
 0x170   :  { %v1301_v6 = vmul.f32 -1.442695, %v576_v52  ;;  %v447_v7 = vpop.f32.mrb[2].mxu0 }
 0x171   :  { %1486 = vpow2.f32 %v1297_v3  ;;  %v579_v8 = vadd.f32 %v558_v57, %v447_v7  ;;  %v536_v9 = vpop.f32.mrb[2].mxu1  ;;  %v449_v10 = vpop.f32.mrb[3].mxu0  ;;  %v1305_v23 = vmul.f32 -1.442695, %v578_v13 }
 0x172   :  { %1488 = vpow2.f32 %v1301_v6  ;;  %v580_v11 = vadd.f32 %v562_v58, %v449_v10  ;;  %v538_v12 = vpop.f32.mrb[3].mxu1  ;;  %v581_v25 = vadd.f32 %v2082_v5, %v536_v9 }
 0x173   :  { %v1298_v14 = vmul.f32 -1.442695, %v579_v8  ;;  %v582_v26 = vadd.f32 %v2078_v4, %v538_v12 }
 0x174   :  { %v1302_v16 = vmul.f32 -1.442695, %v580_v11  ;;  %v453_v17 = vpop.f32.mrb[4].mxu0  ;;  %v2095_v11 = vld [vmem:[#allocation7 + $0x8] sm:$0xff] }
 0x175   :  { %1490 = vpow2.f32 %v1298_v14  ;;  %v583_v18 = vadd.f32 %v558_v57, %v453_v17  ;;  %v542_v19 = vpop.f32.mrb[4].mxu1  ;;  %v455_v20 = vpop.f32.mrb[5].mxu0  ;;  %v1306_v38 = vmul.f32 -1.442695, %v582_v26 }
 0x176   :  { %1492 = vpow2.f32 %v1302_v16  ;;  %v584_v21 = vadd.f32 %v562_v58, %v455_v20  ;;  %v544_v22 = vpop.f32.mrb[5].mxu1  ;;  %v585_v47 = vadd.f32 %v2082_v5, %v542_v19  ;;  %v2098_v20 = vld [vmem:[#allocation7 + $0x10] sm:$0xff] }
 0x177   :  { %v1299_v24 = vmul.f32 -1.442695, %v583_v18  ;;  %1494 = vtanh.f32 %v577_v15  ;;  %v586_v39 = vadd.f32 %v2078_v4, %v544_v22 }
 0x178   :  { %v1303_v27 = vmul.f32 -1.442695, %v584_v21  ;;  %v459_v28 = vpop.f32.mrb[6].mxu0 }
 0x179   :  { %1496 = vpow2.f32 %v1299_v24  ;;  %v587_v29 = vadd.f32 %v558_v57, %v459_v28  ;;  %v548_v30 = vpop.f32.mrb[6].mxu1  ;;  %v461_v31 = vpop.f32.mrb[7].mxu0  ;;  %v1307_v45 = vmul.f32 -1.442695, %v586_v39 }
 0x17a   :  { %1498 = vpow2.f32 %v1303_v27  ;;  %v588_v32 = vadd.f32 %v562_v58, %v461_v31  ;;  %v550_v33 = vpop.f32.mrb[7].mxu1  ;;  %v589_v60 = vadd.f32 %v2082_v5, %v548_v30 }
 0x17b   :  { %v1487_v34 = vpop.eup %1486  ;;  %1500 = vpow2.f32 %v1305_v23  ;;  %v1300_v35 = vmul.f32 -1.442695, %v587_v29  ;;  %v590_v55 = vadd.f32 %v2078_v4, %v550_v33  ;;  %v2101_v33 = vld [vmem:[#allocation7 + $0x18] sm:$0xff] }
 0x17c   :  { %v1489_v36 = vpop.eup %1488  ;;  %v603_v37 = vadd.f32 1.0, %v1487_v34  ;;  %1502 = vtanh.f32 %v581_v25  ;;  %v1304_v41 = vmul.f32 -1.442695, %v588_v32 }
 0x17d   :  { %v627_v40 = vadd.f32 1.0, %v1489_v36  ;;  %1504 = vpow2.f32 %v1300_v35  ;;  %v1308_v3 = vmul.f32 -1.442695, %v590_v55 }
 0x17e   :  { %1506 = vrcp.f32 %v603_v37 }
 0x17f   :  { %v1491_v42 = vpop.eup %1490  ;;  %1508 = vrcp.f32 %v627_v40 }
 0x180   :  { %v1493_v43 = vpop.eup %1492  ;;  %v604_v44 = vadd.f32 1.0, %v1491_v42  ;;  %1510 = vpow2.f32 %v1306_v38 }
 0x181   :  { %v628_v46 = vadd.f32 1.0, %v1493_v43  ;;  %1512 = vpow2.f32 %v1304_v41  ;;  %v1495_v48 = vpop.eup %1494 }
 0x182   :  { %1514 = vrcp.f32 %v604_v44 }
 0x183   :  { %v1497_v49 = vpop.eup %1496  ;;  %1516 = vrcp.f32 %v628_v46 }
 0x184   :  { %v1499_v50 = vpop.eup %1498  ;;  %v605_v51 = vadd.f32 1.0, %v1497_v49  ;;  %1518 = vpow2.f32 %v1307_v45  ;;  %v1123_v49 = vld [vmem:[%s2160_s8] sm:$0xf]  ;;  %s1812_s8 = smov [#allocation14]  }
 0x185   :  { %v1501_v57 = vpop.eup %1500  ;;  %1520 = vtanh.f32 %v585_v47  ;;  %v629_v58 = vadd.f32 1.0, %v1499_v50  ;;  %v1128_v50 = vrot.slane %v1123_v49, %v557_v54  ;;  %s1266_s13 = sshll.u32 %s1812_s8, 4  ;;  %s1267_s13 = int_to_ptr.vmem [resolvable:$true] %s1266_s13 }
 0x186   :  { %v1503_v62 = vpop.eup %1502  ;;  %1522 = vrcp.f32 %v605_v51  ;;  %v655_v8 = vadd.f32 1.0, %v1501_v57  ;;  %v1132_v51 = vrot.slane %v1123_v49, %v561_v56  ;;  %s1768_s14 = scalar_lea.vmem %s1267_s13, 512  ;;  %p1773_p1 = scmp.lt.s32.totalorder %s1267_s13, %s1267_s13 }
 0x187   :  { %v1505_v63 = vpop.eup %1504  ;;  %1524 = vrcp.f32 %v629_v58  ;;  %p1769_p0 = scmp.ne.s32.totalorder %s1267_s13, %s1768_s14  ;;  %p1774_p2 = scmp.lt.s32.totalorder %s1768_s14, %s1768_s14 }
 0x188   :  { %v1507_v52 = vpop.eup %1506  ;;  %v606_v2 = vadd.f32 1.0, %v1505_v63  ;;  %1526 = vtanh.f32 %v589_v60 }
 0x189   :  { %v1509_v6 = vpop.eup %1508  ;;  %v671_v7 = vmul.f32 %v1507_v52, %v1495_v48  ;;  %p1775_p3 = por %p1774_p2, %p1773_p1 }
 0x18a   :  { %v1511_v9 = vpop.eup %1510  ;;  %v667_v4 = vmul.f32 %v1509_v6, %v2092_v1  ;;  %1528 = vrcp.f32 %v606_v2 }
 0x18b   :  { %v1513_v10 = vpop.eup %1512  ;;  %1530 = vpow2.f32 %v1308_v3  ;;  %v656_v18 = vadd.f32 1.0, %v1511_v9  ;;  %p1776_p4 = pnand %p1775_p3, %p1769_p0 }
 0x18c   :  { %v1515_v5 = vpop.eup %1514  ;;  %v675_v12 = vadd.f32 %v671_v7, %v667_v4  ;;  %v630_v13 = vadd.f32 1.0, %v1513_v10  ;;  %1532 = vrcp.f32 %v655_v8  ;;  %v2124_v4 = vrot.slane %v1123_v49, %v565_v61 }
 0x18d   :  { %v1517_v14 = vpop.eup %1516  ;;  %v672_v15 = vmul.f32 %v1515_v5, %v1503_v62  ;;  %v2119_v62 = vrot.slane %v1123_v49, %v569_v59 }
 0x18e   :  { %v1519_v16 = vpop.eup %1518  ;;  %1534 = vtanh.f32 %v675_v12  ;;  %v668_v17 = vmul.f32 %v1517_v14, %v2095_v11 }
 0x18f   :  { %v1521_v19 = vpop.eup %1520  ;;  %1536 = vrcp.f32 %v630_v13  ;;  %v657_v25 = vadd.f32 1.0, %v1519_v16 }
 0x190   :  { %v1523_v21 = vpop.eup %1522  ;;  %v676_v22 = vadd.f32 %v672_v15, %v668_v17  ;;  %1538 = vrcp.f32 %v656_v18 }
 0x191   :  { %v1525_v23 = vpop.eup %1524  ;;  %v673_v24 = vmul.f32 %v1523_v21, %v1521_v19 }
 0x192   :  { %v669_v26 = vmul.f32 %v1525_v23, %v2098_v20  ;;  %v1527_v27 = vpop.eup %1526  ;;  %1540 = vtanh.f32 %v676_v22 }
 0x193   :  { %1542 = vrcp.f32 %v657_v25 }
 0x194   :  { %v1529_v28 = vpop.eup %1528  ;;  %v677_v29 = vadd.f32 %v673_v24, %v669_v26 }
 0x195   :  { %v674_v30 = vmul.f32 %v1529_v28, %v1527_v27  ;;  %v1531_v31 = vpop.eup %1530 }
 0x196   :  { %1544 = vtanh.f32 %v677_v29  ;;  %v1533_v32 = vpop.eup %1532  ;;  %v658_v36 = vadd.f32 1.0, %v1531_v31 }
 0x198   :  { %v1535_v34 = vpop.eup %1534  ;;  %1546 = vrcp.f32 %v658_v36 }
 0x199   :  { %v1537_v35 = vpop.eup %1536  ;;  %v683_v37 = vmul.f32 %v1535_v34, %v1533_v32 }
 0x19a   :  { %v670_v38 = vmul.f32 %v1537_v35, %v2101_v33  ;;  %v1539_v39 = vpop.eup %1538 }
 0x19b   :  { %1010 = vmatmul.mubr.f32.vlgmr.msra.gmra.mrb[8].mxu0 %v683_v37  ;;  %1099 = vmatmul.mubr.f32.vlgmr.msra.gmra.mrb[8].mxu1 %v683_v37 }
 0x19c   :  { %1015 = vmatprep.mubr.f32.mxu0 %v1811_v0  ;;  %1104 = vmatprep.mubr.f32.mxu1 %v1811_v0  ;;  %v678_v40 = vadd.f32 %v674_v30, %v670_v38  ;;  %v1541_v41 = vpop.eup %1540 }
 0x19d   :  { %v684_v42 = vmul.f32 %v1541_v41, %v1539_v39  ;;  %v1543_v43 = vpop.eup %1542 }
 0x19e   :  { %1548 = vtanh.f32 %v678_v40 }
 0x19f   :  { %1016 = vmatmul.mubr.f32.gmra.mrb[10].mxu0 %v684_v42  ;;  %1105 = vmatmul.mubr.f32.gmra.mrb[10].mxu1 %v684_v42 }
 0x1a0   :  { %v1545_v44 = vpop.eup %1544  ;;  %1021 = vmatprep.mubr.f32.mxu0 %v1811_v0  ;;  %1110 = vmatprep.mubr.f32.mxu1 %v1811_v0 }
 0x1a1   :  { %v685_v45 = vmul.f32 %v1545_v44, %v1543_v43 }
 0x1a2   :  { %v1547_v46 = vpop.eup %1546 }
 0x1a3   :  { %1022 = vmatmul.mubr.f32.gmra.mrb[12].mxu0 %v685_v45  ;;  %1111 = vmatmul.mubr.f32.gmra.mrb[12].mxu1 %v685_v45 }
 0x1a4   :  { %1027 = vmatprep.mubr.f32.mxu0 %v1811_v0  ;;  %1116 = vmatprep.mubr.f32.mxu1 %v1811_v0 }
 0x1a8   :  { %v1549_v47 = vpop.eup %1548 }
 0x1a9   :  { %v686_v48 = vmul.f32 %v1549_v47, %v1547_v46 }
 0x1ab   :  { %1028 = vmatmul.mubr.f32.gmra.mrb[14].mxu0 %v686_v48  ;;  %1117 = vmatmul.mubr.f32.gmra.mrb[14].mxu1 %v686_v48 }
 0x26e   :  { %v1011_v55 = vpop.f32.mrb[8].mxu0  ;;  %v1100_v57 = vpop.f32.mrb[8].mxu1 }
 0x26f   :  { %v1145_v58 = vadd.f32 %v1128_v50, %v1011_v55  ;;  %v1013_v60 = vpop.f32.mrb[9].mxu0  ;;  %v1102_v0 = vpop.f32.mrb[9].mxu1  ;;  %v1147_v18 = vadd.f32 %v2124_v4, %v1100_v57 }
 0x270   :  { %v1146_v63 = vadd.f32 %v1132_v51, %v1013_v60  ;;  %v1148_v3 = vadd.f32 %v2119_v62, %v1102_v0 }
 0x271   :  { %v1317_v52 = vmul.f32 -1.442695, %v1145_v58 }
 0x272   :  { %v1321_v2 = vmul.f32 -1.442695, %v1146_v63  ;;  %v1017_v6 = vpop.f32.mrb[10].mxu0  ;;  %v1106_v54 = vpop.f32.mrb[10].mxu1  ;;  %v1325_v59 = vmul.f32 -1.442695, %v1148_v3 }
 0x273   :  { %1550 = vpow2.f32 %v1317_v52  ;;  %v1149_v7 = vadd.f32 %v1128_v50, %v1017_v6  ;;  %v1019_v56 = vpop.f32.mrb[11].mxu0  ;;  %v1108_v8 = vpop.f32.mrb[11].mxu1  ;;  %v1151_v53 = vadd.f32 %v2124_v4, %v1106_v54 }
 0x274   :  { %1552 = vpow2.f32 %v1321_v2  ;;  %v1150_v9 = vadd.f32 %v1132_v51, %v1019_v56  ;;  %v1152_v19 = vadd.f32 %v2119_v62, %v1108_v8 }
 0x275   :  { %v1318_v10 = vmul.f32 -1.442695, %v1149_v7 }
 0x276   :  { %v1322_v5 = vmul.f32 -1.442695, %v1150_v9  ;;  %v1023_v12 = vpop.f32.mrb[12].mxu0  ;;  %v1112_v13 = vpop.f32.mrb[12].mxu1  ;;  %v1326_v25 = vmul.f32 -1.442695, %v1152_v19 }
 0x277   :  { %1554 = vpow2.f32 %v1318_v10  ;;  %v1153_v14 = vadd.f32 %v1128_v50, %v1023_v12  ;;  %v1025_v15 = vpop.f32.mrb[13].mxu0  ;;  %v1114_v16 = vpop.f32.mrb[13].mxu1  ;;  %v1155_v34 = vadd.f32 %v2124_v4, %v1112_v13 }
 0x278   :  { %1556 = vpow2.f32 %v1322_v5  ;;  %v1154_v17 = vadd.f32 %v1132_v51, %v1025_v15  ;;  %v1156_v29 = vadd.f32 %v2119_v62, %v1114_v16 }
 0x279   :  { %v1319_v21 = vmul.f32 -1.442695, %v1153_v14  ;;  %1558 = vpow2.f32 %v1325_v59 }
 0x27a   :  { %v1323_v61 = vmul.f32 -1.442695, %v1154_v17  ;;  %v1327_v40 = vmul.f32 -1.442695, %v1156_v29 }
 0x27b   :  { %1560 = vpow2.f32 %v1319_v21 }
 0x27c   :  { %1562 = vpow2.f32 %v1323_v61 }
 0x27d   :  { %v1551_v22 = vpop.eup %1550  ;;  %1564 = vtanh.f32 %v1147_v18 }
 0x27e   :  { %v1553_v23 = vpop.eup %1552  ;;  %v1173_v24 = vadd.f32 1.0, %v1551_v22  ;;  %v1029_v26 = vpop.f32.mrb[14].mxu0  ;;  %1566 = vtanh.f32 %v1151_v53 }
 0x27f   :  { %v1118_v27 = vpop.f32.mrb[14].mxu1  ;;  %v1197_v28 = vadd.f32 1.0, %v1553_v23  ;;  %v1157_v30 = vadd.f32 %v1128_v50, %v1029_v26  ;;  %v1031_v31 = vpop.f32.mrb[15].mxu0 }
 0x280   :  { %v1120_v32 = vpop.f32.mrb[15].mxu1  ;;  %1568 = vrcp.f32 %v1173_v24  ;;  %v1158_v35 = vadd.f32 %v1132_v51, %v1031_v31  ;;  %v1159_v58 = vadd.f32 %v2124_v4, %v1118_v27 }
 0x281   :  { %1570 = vrcp.f32 %v1197_v28  ;;  %v1320_v36 = vmul.f32 -1.442695, %v1157_v30  ;;  %v1555_v37 = vpop.eup %1554  ;;  %v1160_v60 = vadd.f32 %v2119_v62, %v1120_v32 }
 0x282   :  { %1572 = vpow2.f32 %v1326_v25  ;;  %v1557_v38 = vpop.eup %1556  ;;  %v1174_v39 = vadd.f32 1.0, %v1555_v37  ;;  %v1324_v42 = vmul.f32 -1.442695, %v1158_v35 }
 0x283   :  { %1574 = vpow2.f32 %v1320_v36  ;;  %v1198_v41 = vadd.f32 1.0, %v1557_v38  ;;  %v1559_v43 = vpop.eup %1558  ;;  %v1328_v7 = vmul.f32 -1.442695, %v1160_v60 }
 0x284   :  { %1576 = vtanh.f32 %v1155_v34  ;;  %v1225_v51 = vadd.f32 1.0, %v1559_v43 }
 0x285   :  { %1578 = vrcp.f32 %v1174_v39  ;;  %v1561_v44 = vpop.eup %1560 }
 0x286   :  { %1580 = vrcp.f32 %v1198_v41  ;;  %v1563_v45 = vpop.eup %1562  ;;  %v1175_v46 = vadd.f32 1.0, %v1561_v44 }
 0x287   :  { %1582 = vpow2.f32 %v1327_v40  ;;  %v1565_v47 = vpop.eup %1564  ;;  %v1199_v48 = vadd.f32 1.0, %v1563_v45 }
 0x288   :  { %1584 = vpow2.f32 %v1324_v42  ;;  %v1567_v49 = vpop.eup %1566 }
 0x289   :  { %1586 = vrcp.f32 %v1175_v46 }
 0x28a   :  { %v1569_v50 = vpop.eup %1568  ;;  %1588 = vrcp.f32 %v1199_v48 }
 0x28b   :  { %v1571_v55 = vpop.eup %1570  ;;  %v1241_v57 = vmul.f32 %v1569_v50, %v1565_v47  ;;  %1590 = vrcp.f32 %v1225_v51 }
 0x28c   :  { %v1573_v0 = vpop.eup %1572  ;;  %v1237_v63 = vmul.f32 %v1571_v55, %v2092_v1  ;;  %1592 = vtanh.f32 %v1159_v58 }
 0x28d   :  { %v1575_v52 = vpop.eup %1574  ;;  %v1226_v9 = vadd.f32 1.0, %v1573_v0 }
 0x28e   :  { %v1577_v2 = vpop.eup %1576  ;;  %v1245_v3 = vadd.f32 %v1241_v57, %v1237_v63  ;;  %v1176_v6 = vadd.f32 1.0, %v1575_v52 }
 0x28f   :  { %v1579_v54 = vpop.eup %1578 }
 0x290   :  { %v1581_v56 = vpop.eup %1580  ;;  %1594 = vtanh.f32 %v1245_v3  ;;  %v1242_v8 = vmul.f32 %v1579_v54, %v1567_v49 }
 0x291   :  { %v1583_v10 = vpop.eup %1582  ;;  %v1238_v4 = vmul.f32 %v1581_v56, %v2095_v11  ;;  %1596 = vrcp.f32 %v1176_v6 }
 0x292   :  { %v1585_v62 = vpop.eup %1584  ;;  %1598 = vpow2.f32 %v1328_v7  ;;  %v1227_v14 = vadd.f32 1.0, %v1583_v10 }
 0x293   :  { %v1587_v59 = vpop.eup %1586  ;;  %v1246_v5 = vadd.f32 %v1242_v8, %v1238_v4  ;;  %v1200_v1 = vadd.f32 1.0, %v1585_v62  ;;  %1600 = vrcp.f32 %v1226_v9 }
 0x294   :  { %v1589_v12 = vpop.eup %1588  ;;  %v1243_v13 = vmul.f32 %v1587_v59, %v1577_v2 }
 0x295   :  { %1602 = vtanh.f32 %v1246_v5  ;;  %v1239_v15 = vmul.f32 %v1589_v12, %v2098_v20  ;;  %v1591_v17 = vpop.eup %1590 }
 0x296   :  { %1604 = vrcp.f32 %v1200_v1  ;;  %v1593_v18 = vpop.eup %1592 }
 0x297   :  { %v1247_v16 = vadd.f32 %v1243_v13, %v1239_v15  ;;  %1606 = vrcp.f32 %v1227_v14 }
 0x299   :  { %1608 = vtanh.f32 %v1247_v16 }
 0x29a   :  { %v1595_v11 = vpop.eup %1594 }
 0x29b   :  { %v1597_v19 = vpop.eup %1596  ;;  %v1253_v21 = vmul.f32 %v1595_v11, %v1591_v17 }
 0x29c   :  { %v1244_v53 = vmul.f32 %v1597_v19, %v1593_v18  ;;  %v1599_v61 = vpop.eup %1598 }
 0x29d   :  { %1257 = vst [vmem:[#allocation14] sm:$0xff] %v1253_v21  ;;  %v1601_v22 = vpop.eup %1600  ;;  %v1228_v25 = vadd.f32 1.0, %v1599_v61 }
 0x29f   :  { %v1603_v23 = vpop.eup %1602  ;;  %1610 = vrcp.f32 %v1228_v25 }
 0x2a0   :  { %v1605_v24 = vpop.eup %1604  ;;  %v1254_v26 = vmul.f32 %v1603_v23, %v1601_v22 }
 0x2a1   :  { %v1240_v27 = vmul.f32 %v1605_v24, %v2101_v33  ;;  %v1607_v20 = vpop.eup %1606 }
 0x2a2   :  { %1258 = vst [vmem:[#allocation14 + $0x8] sm:$0xff] %v1254_v26 }
 0x2a3   :  { %v1609_v28 = vpop.eup %1608  ;;  %v1248_v29 = vadd.f32 %v1244_v53, %v1240_v27 }
 0x2a4   :  { %v1255_v30 = vmul.f32 %v1609_v28, %v1607_v20 }
 0x2a5   :  { %1612 = vtanh.f32 %v1248_v29 }
 0x2a6   :  { %1259 = vst [vmem:[#allocation14 + $0x10] sm:$0xff] %v1255_v30 }
 0x2a9   :  { %v1611_v31 = vpop.eup %1610 }
 0x2af   :  { %v1613_v32 = vpop.eup %1612 }
 0x2b0   :  { %v1256_v34 = vmul.f32 %v1613_v32, %v1611_v31 }
 0x2b2   :  { %1260 = vst [vmem:[#allocation14 + $0x18] sm:$0xff] %v1256_v34 }
 0x2b3   :  { %1779 = shalt.err (!%p1776_p4)
}
 0x2b4   :  { %s1780_s18 = scalar_lea.hbm %s2161_s9, 512 }
 0x2b5   :  { %p1781_p5 = scmp.ne.s32.totalorder %s2161_s9, %s1780_s18  ;;  %p1784_p6 = scmp.lt.u32.totalorder %s1780_s18, %s2161_s9 }
 0x2b7   :  { %p1786_p7 = pnand %p1784_p6, %p1781_p5 }
 0x2b9   :  { %1789 = shalt.err (!%p1786_p7)
}
 0x2ba   :  { %1272 = dma.vmem_to_hbm [thread:$0]  %s1267_s13, 512, %s2161_s9, [#allocation4], %s1802_s21, %s1802_s21, %s1803_s22  }
 0x2bb   :  { %1798 = dma.done.wait [#allocation4], 512  }
 0x2bc   :  { %1799 = vsyncadd [#allocation4], 4294966784 }
 0x2bd   :  { %1276 = vsyncpa [#allocation3], 1 }
 0x2be   :  { %1277 = vsyncpa [#allocation6], 1 }
 0x2bf   :  { %1278 = vsyncpa [#allocation9], 1 }
 0x2c0   :  { %1279 = vsyncpa [#allocation12], 1 }
 0x2c1   :  { %1280 = vsyncpa [#allocation4], 1 }

</bundles_post_ra>
